<compile_context>
chip_gen: v7x
topology: tpu7x:2x2x1
jax: 0.10.0
libtpu: 0.0.40
codegen_flags: <defaults>
</compile_context>

<pallas_src>
import functools

import jax
import jax.numpy as jnp
import numpy as np
from jax import lax
from jax.experimental import pallas as pl
from jax.experimental.pallas import tpu as pltpu


def _tap_masks(H, W):
    """(9, H*W) float32 {0,1} validity masks for the 3x3 'same'-padding taps."""
    h = np.arange(H)[:, None]
    w = np.arange(W)[None, :]
    masks = np.zeros((9, H * W), np.float32)
    for k in range(9):
        oy, ox = k // 3 - 1, k % 3 - 1
        valid = (h + oy >= 0) & (h + oy < H) & (w + ox >= 0) & (w + ox < W)
        masks[k] = valid.reshape(-1).astype(np.float32)
    return masks


def _residual_block_kernel(x_ref, w_ref, b_ref, m_ref, o_ref, col_ref, *, W):
    # x_ref : (1, C, H*W)  input image; channels on sublanes, flat spatial lanes
    # w_ref : (C, 9*C)     im2col weights: w2[co, k*C + ci] = weight[co, ci, dy, dx]
    # b_ref : (C, 1)       conv bias
    # m_ref : (9, H*W)     f32 {0,1} per-tap validity masks (zero-pad halo)
    # o_ref : (1, C, H*W)  output
    # col_ref: (9*C, H*W)  VMEM im2col scratch
    _, C, HW = x_ref.shape
    x = x_ref[0].astype(jnp.float32)                     # (C, HW), read once

    # Build the im2col matrix: row-block k holds the input shifted by tap k
    # (lane rotation on the flat spatial axis), with out-of-image positions
    # zeroed via the precomputed mask. No strided reshapes, no padded copy.
    for k in range(9):
        oy, ox = k // 3 - 1, k % 3 - 1
        off = oy * W + ox                                # flat spatial offset
        if off == 0:
            shifted = x                                  # center tap: identity
        else:
            shifted = pltpu.roll(x, (-off) % HW, axis=1)
            shifted = jnp.where(m_ref[k:k + 1, :] > 0.5, shifted, 0.0)
        col_ref[k * C:(k + 1) * C, :] = shifted

    # One fused MXU matmul over all 9 taps: (C, 9C) @ (9C, HW) -> (C, HW).
    conv = jnp.dot(w_ref[...], col_ref[...], preferred_element_type=jnp.float32)
    conv = conv + b_ref[...]                             # (C, 1) bias broadcast
    y = x + jnp.maximum(conv, 0.0)                       # residual + ReLU (f32)
    o_ref[0] = y.astype(o_ref.dtype)


def residual_block(x_nchw, weight_oihw, bias):
    """Pallas TPU equivalent of ResidualBlock.forward: x + relu(conv3x3(x))."""
    N, C, H, W = x_nchw.shape
    HW = H * W
    x_flat = x_nchw.reshape(N, C, HW)                    # free contiguous reshape
    # (Cout, Cin, 3, 3) -> (Cout, 9*Cin), tap-major to match im2col row blocks.
    w2 = jnp.transpose(weight_oihw, (0, 2, 3, 1)).reshape(C, 9 * C)
    b2 = bias.reshape(C, 1)
    masks = jnp.asarray(_tap_masks(H, W))                # (9, HW) f32, fetched once

    kernel = functools.partial(_residual_block_kernel, W=W)
    out_flat = pl.pallas_call(
        kernel,
        out_shape=jax.ShapeDtypeStruct((N, C, HW), x_nchw.dtype),
        grid=(N,),
        in_specs=[
            pl.BlockSpec((1, C, HW), lambda n: (n, 0, 0)),
            pl.BlockSpec((C, 9 * C), lambda n: (0, 0)),
            pl.BlockSpec((C, 1), lambda n: (0, 0)),
            pl.BlockSpec((9, HW), lambda n: (0, 0)),
        ],
        out_specs=pl.BlockSpec((1, C, HW), lambda n: (n, 0, 0)),
        scratch_shapes=[pltpu.VMEM((9 * C, HW), jnp.float32)],
        compiler_params=pltpu.CompilerParams(
            dimension_semantics=("parallel",)),
    )(x_flat, w2, b2, masks)
    return out_flat.reshape(N, C, H, W)


def _reference(x_nchw, weight_oihw, bias):
    """Pure-JAX reference: x + relu(conv2d(x)) in NCHW."""
    conv = lax.conv_general_dilated(
        x_nchw, weight_oihw,
        window_strides=(1, 1), padding=((1, 1), (1, 1)),
        dimension_numbers=("NCHW", "OIHW", "NCHW"))
    conv = conv + bias.reshape(1, -1, 1, 1)
    return x_nchw + jnp.maximum(conv, 0.0)


if __name__ == "__main__":
    key = jax.random.PRNGKey(0)
    k_x, k_w, k_b = jax.random.split(key, 3)

    N, C, H, W = 2, 4, 16, 16
    x = jax.random.normal(k_x, (N, C, H, W), dtype=jnp.float32)
    # deterministic synthetic parameters (PyTorch Conv2d(C, C, 3) shapes)
    weight = jax.random.normal(k_w, (C, C, 3, 3), dtype=jnp.float32) * 0.1
    bias = jax.random.normal(k_b, (C,), dtype=jnp.float32) * 0.1

    out = jax.block_until_ready(residual_block(x, weight, bias))
    ref = jax.block_until_ready(_reference(x, weight, bias))

    assert out.shape == (N, C, H, W)
    assert jnp.allclose(out, ref, atol=1e-5, rtol=1e-5), "mismatch vs reference"

    print("KERNEL_OK")
</pallas_src>

<mosaic_0001>
module attributes {stable_mosaic.version = 11 : i64} {
  func.func @_residual_block_kernel(%arg0: i32, %arg1: memref<1x4x256xf32, #tpu.memory_space<vmem>>, %arg2: memref<4x36xf32, #tpu.memory_space<vmem>>, %arg3: memref<4x1xf32, #tpu.memory_space<vmem>>, %arg4: memref<9x256xf32, #tpu.memory_space<vmem>>, %arg5: memref<1x4x256xf32, #tpu.memory_space<vmem>>, %arg6: memref<36x256xf32, #tpu.memory_space<vmem>>) attributes {dimension_semantics = [#tpu.dimension_semantics<parallel>], iteration_bounds = array<i64: 2>, scalar_prefetch = 0 : i64, scratch_operands = 1 : i64, tpu.core_type = #tpu.core_type<tc>, window_params = [{transform_indices = @transform_0, window_bounds = array<i64: 1, 4, 256>}, {pipeline_mode = #tpu.pipeline_mode<synchronous>, transform_indices = @transform_1, window_bounds = array<i64: 4, 36>}, {pipeline_mode = #tpu.pipeline_mode<synchronous>, transform_indices = @transform_2, window_bounds = array<i64: 4, 1>}, {pipeline_mode = #tpu.pipeline_mode<synchronous>, transform_indices = @transform_3, window_bounds = array<i64: 9, 256>}, {transform_indices = @transform_4, window_bounds = array<i64: 1, 4, 256>}]} {
    %c0 = arith.constant 0 : index
    %c0_0 = arith.constant 0 : index
    %c0_1 = arith.constant 0 : index
    %0 = vector.load %arg1[%c0, %c0_0, %c0_1] : memref<1x4x256xf32, #tpu.memory_space<vmem>>, vector<1x4x256xf32>
    %1 = vector.shape_cast %0 : vector<1x4x256xf32> to vector<4x256xf32>
    %c17_i32 = arith.constant 17 : i32
    %2 = tpu.dynamic_rotate %1 by %c17_i32 dim 1 : vector<4x256xf32>, i32 -> vector<4x256xf32>
    %c0_2 = arith.constant 0 : index
    %c0_3 = arith.constant 0 : index
    %3 = vector.load %arg4[%c0_2, %c0_3] : memref<9x256xf32, #tpu.memory_space<vmem>>, vector<1x256xf32>
    %cst = arith.constant 5.000000e-01 : f32
    %4 = vector.broadcast %cst : f32 to vector<1x256xf32>
    %5 = arith.cmpf ogt, %3, %4 : vector<1x256xf32>
    %cst_4 = arith.constant 0.000000e+00 : f32
    %6 = vector.shape_cast %5 : vector<1x256xi1> to vector<1x256xi1>
    %7 = vector.broadcast %6 : vector<1x256xi1> to vector<4x256xi1>
    %8 = vector.broadcast %cst_4 : f32 to vector<4x256xf32>
    %9 = arith.select %7, %2, %8 : vector<4x256xi1>, vector<4x256xf32>
    %c0_5 = arith.constant 0 : index
    %c0_6 = arith.constant 0 : index
    %10 = vector.load %arg6[%c0_5, %c0_6] : memref<36x256xf32, #tpu.memory_space<vmem>>, vector<4x256xf32>
    tpu.vector_store %arg6[%c0_5, %c0_6], %9 {strides = array<i32>} : memref<36x256xf32, #tpu.memory_space<vmem>>, vector<4x256xf32>,
    %c16_i32 = arith.constant 16 : i32
    %11 = tpu.dynamic_rotate %1 by %c16_i32 dim 1 : vector<4x256xf32>, i32 -> vector<4x256xf32>
    %c1 = arith.constant 1 : index
    %c0_7 = arith.constant 0 : index
    %12 = vector.load %arg4[%c1, %c0_7] : memref<9x256xf32, #tpu.memory_space<vmem>>, vector<1x256xf32>
    %cst_8 = arith.constant 5.000000e-01 : f32
    %13 = vector.broadcast %cst_8 : f32 to vector<1x256xf32>
    %14 = arith.cmpf ogt, %12, %13 : vector<1x256xf32>
    %cst_9 = arith.constant 0.000000e+00 : f32
    %15 = vector.shape_cast %14 : vector<1x256xi1> to vector<1x256xi1>
    %16 = vector.broadcast %15 : vector<1x256xi1> to vector<4x256xi1>
    %17 = vector.broadcast %cst_9 : f32 to vector<4x256xf32>
    %18 = arith.select %16, %11, %17 : vector<4x256xi1>, vector<4x256xf32>
    %c4 = arith.constant 4 : index
    %c0_10 = arith.constant 0 : index
    %19 = vector.load %arg6[%c4, %c0_10] : memref<36x256xf32, #tpu.memory_space<vmem>>, vector<4x256xf32>
    tpu.vector_store %arg6[%c4, %c0_10], %18 {strides = array<i32>} : memref<36x256xf32, #tpu.memory_space<vmem>>, vector<4x256xf32>,
    %c15_i32 = arith.constant 15 : i32
    %20 = tpu.dynamic_rotate %1 by %c15_i32 dim 1 : vector<4x256xf32>, i32 -> vector<4x256xf32>
    %c2 = arith.constant 2 : index
    %c0_11 = arith.constant 0 : index
    %21 = vector.load %arg4[%c2, %c0_11] : memref<9x256xf32, #tpu.memory_space<vmem>>, vector<1x256xf32>
    %cst_12 = arith.constant 5.000000e-01 : f32
    %22 = vector.broadcast %cst_12 : f32 to vector<1x256xf32>
    %23 = arith.cmpf ogt, %21, %22 : vector<1x256xf32>
    %cst_13 = arith.constant 0.000000e+00 : f32
    %24 = vector.shape_cast %23 : vector<1x256xi1> to vector<1x256xi1>
    %25 = vector.broadcast %24 : vector<1x256xi1> to vector<4x256xi1>
    %26 = vector.broadcast %cst_13 : f32 to vector<4x256xf32>
    %27 = arith.select %25, %20, %26 : vector<4x256xi1>, vector<4x256xf32>
    %c8 = arith.constant 8 : index
    %c0_14 = arith.constant 0 : index
    %28 = vector.load %arg6[%c8, %c0_14] : memref<36x256xf32, #tpu.memory_space<vmem>>, vector<4x256xf32>
    tpu.vector_store %arg6[%c8, %c0_14], %27 {strides = array<i32>} : memref<36x256xf32, #tpu.memory_space<vmem>>, vector<4x256xf32>,
    %c1_i32 = arith.constant 1 : i32
    %29 = tpu.dynamic_rotate %1 by %c1_i32 dim 1 : vector<4x256xf32>, i32 -> vector<4x256xf32>
    %c3 = arith.constant 3 : index
    %c0_15 = arith.constant 0 : index
    %30 = vector.load %arg4[%c3, %c0_15] : memref<9x256xf32, #tpu.memory_space<vmem>>, vector<1x256xf32>
    %cst_16 = arith.constant 5.000000e-01 : f32
    %31 = vector.broadcast %cst_16 : f32 to vector<1x256xf32>
    %32 = arith.cmpf ogt, %30, %31 : vector<1x256xf32>
    %cst_17 = arith.constant 0.000000e+00 : f32
    %33 = vector.shape_cast %32 : vector<1x256xi1> to vector<1x256xi1>
    %34 = vector.broadcast %33 : vector<1x256xi1> to vector<4x256xi1>
    %35 = vector.broadcast %cst_17 : f32 to vector<4x256xf32>
    %36 = arith.select %34, %29, %35 : vector<4x256xi1>, vector<4x256xf32>
    %c12 = arith.constant 12 : index
    %c0_18 = arith.constant 0 : index
    %37 = vector.load %arg6[%c12, %c0_18] : memref<36x256xf32, #tpu.memory_space<vmem>>, vector<4x256xf32>
    tpu.vector_store %arg6[%c12, %c0_18], %36 {strides = array<i32>} : memref<36x256xf32, #tpu.memory_space<vmem>>, vector<4x256xf32>,
    %c16 = arith.constant 16 : index
    %c0_19 = arith.constant 0 : index
    %38 = vector.load %arg6[%c16, %c0_19] : memref<36x256xf32, #tpu.memory_space<vmem>>, vector<4x256xf32>
    tpu.vector_store %arg6[%c16, %c0_19], %1 {strides = array<i32>} : memref<36x256xf32, #tpu.memory_space<vmem>>, vector<4x256xf32>,
    %c255_i32 = arith.constant 255 : i32
    %39 = tpu.dynamic_rotate %1 by %c255_i32 dim 1 : vector<4x256xf32>, i32 -> vector<4x256xf32>
    %c5 = arith.constant 5 : index
    %c0_20 = arith.constant 0 : index
    %40 = vector.load %arg4[%c5, %c0_20] : memref<9x256xf32, #tpu.memory_space<vmem>>, vector<1x256xf32>
    %cst_21 = arith.constant 5.000000e-01 : f32
    %41 = vector.broadcast %cst_21 : f32 to vector<1x256xf32>
    %42 = arith.cmpf ogt, %40, %41 : vector<1x256xf32>
    %cst_22 = arith.constant 0.000000e+00 : f32
    %43 = vector.shape_cast %42 : vector<1x256xi1> to vector<1x256xi1>
    %44 = vector.broadcast %43 : vector<1x256xi1> to vector<4x256xi1>
    %45 = vector.broadcast %cst_22 : f32 to vector<4x256xf32>
    %46 = arith.select %44, %39, %45 : vector<4x256xi1>, vector<4x256xf32>
    %c20 = arith.constant 20 : index
    %c0_23 = arith.constant 0 : index
    %47 = vector.load %arg6[%c20, %c0_23] : memref<36x256xf32, #tpu.memory_space<vmem>>, vector<4x256xf32>
    tpu.vector_store %arg6[%c20, %c0_23], %46 {strides = array<i32>} : memref<36x256xf32, #tpu.memory_space<vmem>>, vector<4x256xf32>,
    %c241_i32 = arith.constant 241 : i32
    %48 = tpu.dynamic_rotate %1 by %c241_i32 dim 1 : vector<4x256xf32>, i32 -> vector<4x256xf32>
    %c6 = arith.constant 6 : index
    %c0_24 = arith.constant 0 : index
    %49 = vector.load %arg4[%c6, %c0_24] : memref<9x256xf32, #tpu.memory_space<vmem>>, vector<1x256xf32>
    %cst_25 = arith.constant 5.000000e-01 : f32
    %50 = vector.broadcast %cst_25 : f32 to vector<1x256xf32>
    %51 = arith.cmpf ogt, %49, %50 : vector<1x256xf32>
    %cst_26 = arith.constant 0.000000e+00 : f32
    %52 = vector.shape_cast %51 : vector<1x256xi1> to vector<1x256xi1>
    %53 = vector.broadcast %52 : vector<1x256xi1> to vector<4x256xi1>
    %54 = vector.broadcast %cst_26 : f32 to vector<4x256xf32>
    %55 = arith.select %53, %48, %54 : vector<4x256xi1>, vector<4x256xf32>
    %c24 = arith.constant 24 : index
    %c0_27 = arith.constant 0 : index
    %56 = vector.load %arg6[%c24, %c0_27] : memref<36x256xf32, #tpu.memory_space<vmem>>, vector<4x256xf32>
    tpu.vector_store %arg6[%c24, %c0_27], %55 {strides = array<i32>} : memref<36x256xf32, #tpu.memory_space<vmem>>, vector<4x256xf32>,
    %c240_i32 = arith.constant 240 : i32
    %57 = tpu.dynamic_rotate %1 by %c240_i32 dim 1 : vector<4x256xf32>, i32 -> vector<4x256xf32>
    %c7 = arith.constant 7 : index
    %c0_28 = arith.constant 0 : index
    %58 = vector.load %arg4[%c7, %c0_28] : memref<9x256xf32, #tpu.memory_space<vmem>>, vector<1x256xf32>
    %cst_29 = arith.constant 5.000000e-01 : f32
    %59 = vector.broadcast %cst_29 : f32 to vector<1x256xf32>
    %60 = arith.cmpf ogt, %58, %59 : vector<1x256xf32>
    %cst_30 = arith.constant 0.000000e+00 : f32
    %61 = vector.shape_cast %60 : vector<1x256xi1> to vector<1x256xi1>
    %62 = vector.broadcast %61 : vector<1x256xi1> to vector<4x256xi1>
    %63 = vector.broadcast %cst_30 : f32 to vector<4x256xf32>
    %64 = arith.select %62, %57, %63 : vector<4x256xi1>, vector<4x256xf32>
    %c28 = arith.constant 28 : index
    %c0_31 = arith.constant 0 : index
    %65 = vector.load %arg6[%c28, %c0_31] : memref<36x256xf32, #tpu.memory_space<vmem>>, vector<4x256xf32>
    tpu.vector_store %arg6[%c28, %c0_31], %64 {strides = array<i32>} : memref<36x256xf32, #tpu.memory_space<vmem>>, vector<4x256xf32>,
    %c239_i32 = arith.constant 239 : i32
    %66 = tpu.dynamic_rotate %1 by %c239_i32 dim 1 : vector<4x256xf32>, i32 -> vector<4x256xf32>
    %c8_32 = arith.constant 8 : index
    %c0_33 = arith.constant 0 : index
    %67 = vector.load %arg4[%c8_32, %c0_33] : memref<9x256xf32, #tpu.memory_space<vmem>>, vector<1x256xf32>
    %cst_34 = arith.constant 5.000000e-01 : f32
    %68 = vector.broadcast %cst_34 : f32 to vector<1x256xf32>
    %69 = arith.cmpf ogt, %67, %68 : vector<1x256xf32>
    %cst_35 = arith.constant 0.000000e+00 : f32
    %70 = vector.shape_cast %69 : vector<1x256xi1> to vector<1x256xi1>
    %71 = vector.broadcast %70 : vector<1x256xi1> to vector<4x256xi1>
    %72 = vector.broadcast %cst_35 : f32 to vector<4x256xf32>
    %73 = arith.select %71, %66, %72 : vector<4x256xi1>, vector<4x256xf32>
    %c32 = arith.constant 32 : index
    %c0_36 = arith.constant 0 : index
    %74 = vector.load %arg6[%c32, %c0_36] : memref<36x256xf32, #tpu.memory_space<vmem>>, vector<4x256xf32>
    tpu.vector_store %arg6[%c32, %c0_36], %73 {strides = array<i32>} : memref<36x256xf32, #tpu.memory_space<vmem>>, vector<4x256xf32>,
    %c0_37 = arith.constant 0 : index
    %c0_38 = arith.constant 0 : index
    %75 = vector.load %arg2[%c0_37, %c0_38] : memref<4x36xf32, #tpu.memory_space<vmem>>, vector<4x36xf32>
    %c0_39 = arith.constant 0 : index
    %c0_40 = arith.constant 0 : index
    %76 = vector.load %arg6[%c0_39, %c0_40] : memref<36x256xf32, #tpu.memory_space<vmem>>, vector<36x256xf32>
    %cst_41 = arith.constant dense<0.000000e+00> : vector<4x256xf32>
    %77 = tpu.matmul %75, %76, %cst_41 {dimension_numbers = #tpu.dot_dimension_numbers<[1], [0], [0], [1], [0, 0, 1, 1], [], []>} : vector<4x36xf32>, vector<36x256xf32>, vector<4x256xf32> -> vector<4x256xf32>
    %c0_42 = arith.constant 0 : index
    %c0_43 = arith.constant 0 : index
    %78 = vector.load %arg3[%c0_42, %c0_43] : memref<4x1xf32, #tpu.memory_space<vmem>>, vector<4x1xf32>
    %79 = vector.broadcast %78 : vector<4x1xf32> to vector<4x256xf32>
    %80 = arith.addf %77, %79 : vector<4x256xf32>
    %cst_44 = arith.constant 0.000000e+00 : f32
    %81 = vector.broadcast %cst_44 : f32 to vector<4x256xf32>
    %82 = arith.maximumf %80, %81 : vector<4x256xf32>
    %83 = arith.addf %1, %82 : vector<4x256xf32>
    %c0_45 = arith.constant 0 : index
    %c0_46 = arith.constant 0 : index
    %c0_47 = arith.constant 0 : index
    %84 = vector.load %arg5[%c0_45, %c0_46, %c0_47] : memref<1x4x256xf32, #tpu.memory_space<vmem>>, vector<1x4x256xf32>
    %85 = vector.shape_cast %84 : vector<1x4x256xf32> to vector<4x256xf32>
    %86 = vector.shape_cast %83 : vector<4x256xf32> to vector<1x4x256xf32>
    tpu.vector_store %arg5[%c0_45, %c0_46, %c0_47], %86 {strides = array<i32>} : memref<1x4x256xf32, #tpu.memory_space<vmem>>, vector<1x4x256xf32>,
    return
  }
  func.func @transform_0(%arg0: i32) -> (i32, i32, i32) {
    %c0_i32 = arith.constant 0 : i32
    %c0_i32_0 = arith.constant 0 : i32
    %c0_i32_1 = arith.constant 0 : i32
    return %arg0, %c0_i32, %c0_i32_0 : i32, i32, i32
  }
  func.func @transform_1(%arg0: i32) -> (i32, i32) {
    %c0_i32 = arith.constant 0 : i32
    %c0_i32_0 = arith.constant 0 : i32
    %c0_i32_1 = arith.constant 0 : i32
    return %c0_i32, %c0_i32_0 : i32, i32
  }
  func.func @transform_2(%arg0: i32) -> (i32, i32) {
    %c0_i32 = arith.constant 0 : i32
    %c0_i32_0 = arith.constant 0 : i32
    %c0_i32_1 = arith.constant 0 : i32
    return %c0_i32, %c0_i32_0 : i32, i32
  }
  func.func @transform_3(%arg0: i32) -> (i32, i32) {
    %c0_i32 = arith.constant 0 : i32
    %c0_i32_0 = arith.constant 0 : i32
    %c0_i32_1 = arith.constant 0 : i32
    return %c0_i32, %c0_i32_0 : i32, i32
  }
  func.func @transform_4(%arg0: i32) -> (i32, i32, i32) {
    %c0_i32 = arith.constant 0 : i32
    %c0_i32_0 = arith.constant 0 : i32
    %c0_i32_1 = arith.constant 0 : i32
    return %arg0, %c0_i32, %c0_i32_0 : i32, i32, i32
  }
}

</mosaic_0001>

<bundles_post_ra>
// kernel: tpu_custom_call.1
= control target key start
LH: loop header
LB: loop body
LE: loop exit
PB: predicated region body
PF: predicated region fallthrough
CT: control target
= control target key end

     0   :  { %9 = vsyncpa [#allocation4], 0  ;;  %s1284_s0 = inlined_call_operand.hbm [shape: f32[2,4,256], index: 0, kind: input, shape index: {}]   ;;  %s1285_s1 = inlined_call_operand.vmem [shape: f32[4,36], index: 1, kind: input, shape index: {}]   ;;  %s1286_s2 = inlined_call_operand.vmem [shape: f32[4,1], index: 2, kind: input, shape index: {}]   ;;  %s1287_s3 = inlined_call_operand.hbm [shape: f32[9,256], index: 3, kind: input, shape index: {}]   ;;  %s1288_s4 = inlined_call_operand.hbm [shape: f32[2,4,256], index: 4, kind: output, shape index: {}]  }
   0x1   :  { %11 = vsyncpa [#allocation4 + $0x1], 0 }
   0x2   :  { %12 = vsyncpa [#allocation7], 0 }
   0x3   :  { %13 = vsyncpa [#allocation5], 0 }
   0x4   :  { %15 = vsyncpa [#allocation5 + $0x1], 0  ;;  %s932_s15 = smov 0   ;;  %s934_s16 = smov 0  }
   0x5   :  { %s936_s17 = smov 0   ;;  %s938_s18 = smov 0  }
   0x6 LB: > { %s953_s19 = sadd.s32 4294967295, %s890_s18   ;;  %s662_s20 = sadd.s32 4294967294, %s890_s18   ;;  %s890_s18 = sphi %s938_s18, %s1332_s18   ;;  %s886_s17 = sphi %s936_s17, %s1331_s17   ;;  %s882_s16 = sphi %s934_s16, %s1330_s16   ;;  %s878_s15 = sphi %s932_s15, %s1329_s15  }
   0x7   : > { %p41_p0 = scmp.ne.s32.totalorder %s882_s16, %s878_s15  ;;  %p1289_p1 = scmp.eq.s32.totalorder %s953_s19, 0 }
   0x8   : > { %p134_p3 = scmp.eq.s32.totalorder %s662_s20, 1  ;;  %p663_p5 = scmp.ge.s32.totalorder %s890_s18, 1 }
   0x9   : > { %p962_p4 = por %p1289_p1, %p41_p0  ;;  %p141_p7 = scmp.lt.s32.totalorder %s890_s18, 3 }
   0xa   : > { %p967_p6 = por %p134_p3, %p41_p0  ;;  %s892_s24 = smov [#allocation6]  }
   0xb   : > { %s1292_s21 = scalar_select %p962_p4, 1, 0 }
   0xc   : > { %s1293_s22 = scalar_select %p967_p6, 1, 0 }
   0xd   : > { %p972_p8 = pnand %p663_p5, %p141_p7  ;;  %s159_s25 = sshll.u32 %s892_s24, 4  ;;  %s976_s25 = int_to_ptr.vmem [resolvable:$true] %s159_s25 }
   0xe   : > { %s988_s27 = sadd.s32 1, %s890_s18   ;;  %s28_s28 = sadd.s32 1, %s886_s17 }
   0xf   : > { %s1294_s23 = scalar_select %p972_p8, 1, 0 }
  0x10   : > { %p699_p9 = pneg %p972_p8  ;;  %s25_s29 = ssub.s32 %s890_s18, %s988_s27 }
  0x11   : > { %s762_s6 = scalar_lea.hbm %s1287_s3, 512 }
  0x12   : > { %p983_p11 = pnand %p699_p9, %p1289_p1  ;;  %p763_p12 = scmp.ne.s32.totalorder %s1287_s3, %s762_s6 }
  0x13   : > { %p769_p5 = scmp.lt.u32.totalorder %s762_s6, %s1287_s3 }
  0x14   : > { %p764_p13 = pneg %p983_p11 }
  0x16   : > { %p765_p0 = pnand %p764_p13, %p763_p12 }
  0x18   : > { %p766_p3 = pneg %p765_p0 }
  0x1a   : > { %p771_p7 = pnand %p769_p5, %p766_p3 }
  0x1c   : > { %774 = shalt.err (!%p771_p7)
}
  0x1d   : > { %s775_s11 = scalar_lea.vmem %s976_s25, 512  ;;  %p783_p2 = scmp.lt.s32.totalorder %s976_s25, %s976_s25 }
  0x1e   : > { %p776_p9 = scmp.ne.s32.totalorder %s976_s25, %s775_s11  ;;  %p784_p6 = scmp.lt.s32.totalorder %s775_s11, %s775_s11 }
  0x20   : > { %p778_p10 = pnand %p776_p9, %p764_p13  ;;  %p785_p4 = por %p784_p6, %p783_p2 }
  0x22   : > { %p779_p1 = pneg %p778_p10 }
  0x24   : > { %p786_p8 = pnand %p785_p4, %p779_p1 }
  0x26   : > { %789 = shalt.err (!%p786_p8)
}
  0x27   : > { %s893_s12 = smov 256   ;;  %s894_s13 = smov 16  }
  0x28   : > { %702 = dma.hbm_to_vmem [thread:$0]  (!%p983_p11), %s1287_s3, 512, %s976_s25, [#allocation7], %s893_s12, %s893_s12, %s894_s13  }
  0x29   : > { %p26_p2 = scmp.eq.s32.totalorder %s25_s29, 0  ;;  %p35_p1 = scmp.ne.s32.totalorder %s886_s17, %s882_s16 }
  0x2a   : > { %p36_p4 = scmp.eq.s32.totalorder %s890_s18, 0  ;;  %p712_p6 = scmp.lt.s32.totalorder %s890_s18, 2 }
  0x2b   : > { %s1019_s24 = scalar_select %p26_p2, %s886_s17, %s28_s28  }
  0x2c   : > { %p37_p8 = por %p36_p4, %p35_p1  ;;  %p1296_p10 = scmp.eq.s32.totalorder %s953_s19, 1 }
  0x2d   : > { %s173_s5 = sand.u32 1, %s886_s17   ;;  %s681_s6 = sshll.u32 %s890_s18, 7 }
  0x2e   : > { %p1023_p12 = por %p1296_p10, %p35_p1  ;;  %s666_s7 = sshll.u32 %s173_s5, 3 }
  0x2f   : > { %s1032_s9 = scalar_lea.hbm %s1284_s0, %s681_s6  ;;  %s177_s25 = scalar_lea.vmem [#allocation3], %s666_s7 }
  0x30   : > { %s185_s28 = sshll.u32 %s177_s25, 4  ;;  %p1034_p11 = pnand %p712_p6, %p37_p8  ;;  %s1038_s28 = int_to_ptr.vmem [resolvable:$true] %s185_s28 }
  0x31   : > { %s174_s10 = scalar_lea.sflag [#allocation4], %s173_s5  ;;  %s790_s11 = scalar_lea.hbm %s1032_s9, 128 }
  0x32   : > { %p791_p13 = scmp.ne.s32.totalorder %s1032_s9, %s790_s11  ;;  %p792_p0 = pneg %p1034_p11 }
  0x33   : > { %s795_s14 = scalar_lea.hbm %s1284_s0, 256  ;;  %p796_p7 = scmp.lt.u32.totalorder %s1032_s9, %s1284_s0 }
  0x34   : > { %p793_p3 = pnand %p792_p0, %p791_p13  ;;  %p797_p9 = scmp.lt.u32.totalorder %s795_s14, %s790_s11 }
  0x35   : > { %p799_p1 = scmp.lt.u32.totalorder %s790_s11, %s1032_s9 }
  0x36   : > { %p794_p5 = pneg %p793_p3  ;;  %p798_p2 = por %p797_p9, %p796_p7 }
  0x38   : > { %p800_p4 = por %p799_p1, %p798_p2 }
  0x3a   : > { %p801_p6 = pnand %p800_p4, %p794_p5 }
  0x3c   : > { %804 = shalt.err (!%p801_p6)
}
  0x3d   : > { %s805_s5 = scalar_lea.vmem %s1038_s28, 128  ;;  %s895_s7 = smov [#allocation3]  }
  0x3e   : > { %p806_p8 = scmp.ne.s32.totalorder %s1038_s28, %s805_s5  ;;  %s810_s26 = sshll.u32 %s895_s7, 4  ;;  %s811_s26 = int_to_ptr.vmem [resolvable:$false] %s810_s26 }
  0x3f   : > { %s812_s8 = scalar_lea.vmem %s811_s26, 256  ;;  %p813_p3 = scmp.lt.s32.totalorder %s1038_s28, %s811_s26 }
  0x40   : > { %p808_p10 = pnand %p806_p8, %p792_p0  ;;  %p814_p7 = scmp.lt.s32.totalorder %s812_s8, %s805_s5 }
  0x42   : > { %p809_p13 = pneg %p808_p10  ;;  %p815_p9 = por %p814_p7, %p813_p3 }
  0x44   : > { %p816_p2 = pnand %p815_p9, %p809_p13 }
  0x46   : > { %819 = shalt.err (!%p816_p2)
}
  0x47   : > { %706 = dma.hbm_to_vmem [thread:$0]  (!%p1034_p11), %s1032_s9, 128, %s1038_s28, %s174_s10  }
  0x48   : > { %p1299_p5 = scmp.ne.s32.totalorder %s1294_s23, 0 }
  0x49   : > { %s1068_s25 = sand.u32 (!%p1299_p5), 1, %s882_s16   ;;  %p1300_p0 = scmp.ne.s32.totalorder (!%p1299_p5), %s1292_s21, 0 }
  0x4a   : > { %194 = sbr.rel (%p1299_p5) target bundleno = 479 (0x1df), region = 36  ;;  %s670_s11 = sshll.u32 (!%p1299_p5), %s1068_s25, 3 }
  0x4b   : > { %s197_s12 = scalar_lea.sflag (!%p1299_p5), [#allocation4], %s1068_s25  ;;  %s200_s13 = scalar_lea.vmem (!%p1299_p5), [#allocation3], %s670_s11 }
  0x51   : > { %865 = dma.done.wait (%p1300_p0), %s197_s12, 128  }
  0x52   : > { %867 = vsyncadd (%p1300_p0), %s197_s12, 4294967168  ;;  %p1301_p11 = scmp.eq.s32.totalorder %s953_s19, 0 }
  0x54   : > { %869 = dma.done.wait (%p1301_p11), [#allocation7], 512   ;;  %p1302_p1 = pmov %p1301_p11 }
  0x55   : > { %v896_v0 = vmov 0   ;;  %v1083_v1 = vld [vmem:[%s200_s13] sm:$0xff]  ;;  %s897_s23 = smov 1   ;;  %s898_s9 = smov 16   ;;  %v905_v3 = vmov 0.0   ;;  %v237_v5 = vlaneseq }
  0x56   : > { %871 = vsyncadd (%p1302_p1), [#allocation7], 4294966784  ;;  %760 = vset.pattern.permute.xlu0 %v896_v0  ;;  %315 = vrot.lane.b32.xlu1 %v1083_v1, %s897_s23  ;;  %346 = vst [vmem:[#allocation2 + $0x20] sm:$0xf] %v1083_v1  ;;  %v231_v2 = vcombine.high %v1083_v1, %v1083_v1  ;;  %s899_s21 = smov 17   ;;  %s900_s28 = smov 15  }
  0x57   : > { %259 = vrot.lane.b32.xlu0 %v1083_v1, %s898_s9  ;;  %s901_s29 = smov 127   ;;  %s902_s10 = smov 112   ;;  %552 = vmatprep.mubr.f32.mxu0 %v905_v3  ;;  %v471_v4 = vld [vmem:[%s1286_s2] sm:$0xf]  ;;  %v246_v7 = vshrl.u32 %v237_v5, 7  ;;  %v1104_v14 = vand.u32 127, %v237_v5 }
  0x58   : > { %347 = vst [vmem:[#allocation2 + $0x28] sm:$0xf] %v231_v2  ;;  %s903_s14 = smov 113   ;;  %s904_s20 = smov 111  }
  0x59   : > { %v323_v6 = vld [vmem:[#allocation6 + $0x3] ss:$8 sm:$0x3]  ;;  %v242_v8 = vld [vmem:[#allocation6] ss:$8 sm:$0x3] }
  0x5a   : > { %317 = vrot.lane.b32.xlu1 %v231_v2, %s897_s23  ;;  %vm324_vm0 = vcmp.gt.f32.partialorder %v323_v6, 0.5  ;;  %v267_v9 = vld [vmem:[#allocation6 + $0x1] ss:$8 sm:$0x3]  ;;  %vm243_vm1 = vcmp.gt.f32.partialorder %v242_v8, 0.5  ;;  %v1099_v10 = vsub.s32 0, %v246_v7 }
  0x5b   : > { %233 = vrot.lane.b32.xlu0 %v1083_v1, %s899_s21  ;;  %v1101_v11 = vsub.s32 1, %v246_v7  ;;  %v298_v12 = vld [vmem:[#allocation6 + $0x2] ss:$8 sm:$0x3]  ;;  %v325_v13 = vsel %vm324_vm0, 1, %v896_v0  ;;  %vm268_vm2 = vcmp.gt.f32.partialorder %v267_v9, 0.5 }
  0x5c   : > { %v244_v15 = vsel %vm243_vm1, 1, %v896_v0  ;;  %vm299_vm3 = vcmp.gt.f32.partialorder %v298_v12, 0.5  ;;  %v329_v16 = vrot.slane %v325_v13, %v1099_v10  ;;  %v269_v18 = vsel %vm268_vm2, 1, %v896_v0  ;;  %v356_v25 = vld [vmem:[#allocation6 + $0x5] ss:$8 sm:$0x3] }
  0x5d   : > { %v333_v17 = vrot.slane %v325_v13, %v1101_v11  ;;  %v248_v21 = vrot.slane %v244_v15, %v1099_v10  ;;  %vm319_vm4 = vcmp.lt.s32.totalorder %v1104_v14, 1  ;;  %vm239_vm5 = vcmp.lt.s32.totalorder %v1104_v14, 17  ;;  %v412_v26 = vld [vmem:[#allocation6 + $0x7] ss:$8 sm:$0x3]  ;;  %s682_s8 = sshll.u32 %s953_s19, 7 }
  0x5e   : > { %235 = vrot.lane.b32.xlu1 %v231_v2, %s899_s21  ;;  %v300_v22 = vsel %vm299_vm3, 1, %v896_v0  ;;  %v252_v23 = vrot.slane %v244_v15, %v1101_v11  ;;  %v273_v24 = vrot.slane %v269_v18, %v1099_v10  ;;  %vm1116_vm6 = vcmp.eq.s32.totalorder %v329_v16, 1  ;;  %v387_v35 = vld [vmem:[#allocation6 + $0x6] ss:$8 sm:$0x3]  ;;  %s228_s12 = scalar_lea.vmem [#allocation8], %s670_s11  ;;  %s1240_s21 = scalar_lea.hbm %s1288_s4, %s682_s8 }
  0x5f   : > { %261 = vrot.lane.b32.xlu0 %v231_v2, %s898_s9  ;;  %vm1120_vm7 = vcmp.eq.s32.totalorder %v333_v17, 1  ;;  %vm263_vm8 = vcmp.lt.s32.totalorder %v1104_v14, 16  ;;  %v277_v29 = vrot.slane %v269_v18, %v1101_v11  ;;  %vm1126_vm9 = vcmp.eq.s32.totalorder %v248_v21, 1  ;;  %v443_v5 = vld [vmem:[#allocation6 + $0x10] ss:$8 sm:$0x3] }
  0x60   : > { %vm294_vm10 = vcmp.lt.s32.totalorder %v1104_v14, 15  ;;  %v304_v33 = vrot.slane %v300_v22, %v1099_v10  ;;  %v308_v34 = vrot.slane %v300_v22, %v1101_v11  ;;  %vm357_vm11 = vcmp.gt.f32.partialorder %v356_v25, 0.5  ;;  %s582_s13 = sshll.u32 %s228_s12, 4  ;;  %s906_s19 = smov [#allocation8]   ;;  %s1242_s13 = int_to_ptr.vmem [resolvable:$true] %s582_s13 }
  0x61   : > { %vm413_vm12 = vcmp.gt.f32.partialorder %v412_v26, 0.5  ;;  %vm1141_vm13 = vcmp.eq.s32.totalorder %v252_v23, 1  ;;  %vm1145_vm14 = vcmp.eq.s32.totalorder %v273_v24, 1  ;;  %vm1149_vm15 = vcmp.eq.s32.totalorder %v277_v29, 1  ;;  %s824_s11 = sshll.u32 %s906_s19, 4  ;;  %s825_s11 = int_to_ptr.vmem [resolvable:$false] %s824_s11 }
  0x62   : > { %292 = vrot.lane.b32.xlu1 %v231_v2, %s900_s28  ;;  %vm388_vm0 = vcmp.gt.f32.partialorder %v387_v35, 0.5  ;;  %vm1153_vm1 = vcmp.eq.s32.totalorder %v304_v33, 1  ;;  %vm1157_vm2 = vcmp.eq.s32.totalorder %v308_v34, 1  ;;  %v358_v49 = vsel %vm357_vm11, 1, %v896_v0  ;;  %p827_p10 = scmp.lt.s32.totalorder %s1242_s13, %s825_s11 }
  0x63   : > { %290 = vrot.lane.b32.xlu0 %v1083_v1, %s900_s28  ;;  %v414_v50 = vsel %vm413_vm12, 1, %v896_v0  ;;  %v362_v61 = vrot.slane %v358_v49, %v1099_v10  ;;  %v366_v62 = vrot.slane %v358_v49, %v1101_v11  ;;  %vm352_vm3 = vcmp.lt.s32.totalorder %v1104_v14, 127  ;;  %s568_s28 = scalar_lea.sflag [#allocation5], %s1068_s25 }
  0x64   : > { %v418_v8 = vrot.slane %v414_v50, %v1099_v10  ;;  %v389_v9 = vsel %vm388_vm0, 1, %v896_v0  ;;  %v422_v12 = vrot.slane %v414_v50, %v1101_v11  ;;  %vm481_vm0 = vcmask 1043456  }
  0x65   : > { %v393_v18 = vrot.slane %v389_v9, %v1099_v10 }
  0x66   : > { %350 = vrot.lane.b32.xlu1 %v231_v2, %s901_s29 }
  0x67   : > { %348 = vrot.lane.b32.xlu0 %v1083_v1, %s901_s29  ;;  %vm1207_vm11 = vcmp.eq.s32.totalorder %v393_v18, 1  ;;  %s820_s29 = scalar_lea.vmem %s1242_s13, 128 }
  0x68   : > { %p821_p4 = scmp.ne.s32.totalorder %s1242_s13, %s820_s29 }
  0x6a   : > { %406 = vrot.lane.b32.xlu1 %v231_v2, %s902_s10  ;;  %p822_p6 = pnand %p821_p4, %p1023_p12 }
  0x6b   : > { %404 = vrot.lane.b32.xlu0 %v1083_v1, %s902_s10  ;;  %s826_s10 = scalar_lea.vmem %s825_s11, 256 }
  0x6c   : > { %p823_p8 = pneg %p822_p6  ;;  %p828_p13 = scmp.lt.s32.totalorder %s826_s10, %s820_s29 }
  0x6e   : > { %381 = vrot.lane.b32.xlu1 %v231_v2, %s903_s14  ;;  %p829_p3 = por %p828_p13, %p827_p10 }
  0x6f   : > { %379 = vrot.lane.b32.xlu0 %v1083_v1, %s903_s14 }
  0x70   : > { %p830_p7 = pnand %p829_p3, %p823_p8 }
  0x72   : > { %437 = vrot.lane.b32.xlu1 %v231_v2, %s904_s20 }
  0x73   : > { %435 = vrot.lane.b32.xlu0 %v1083_v1, %s904_s20 }
  0x77   : > { %474 = vperm.xlu0 %760, %v471_v4  }
  0xc8   : > { %v316_v19 = vpop.permute.xlu1 %315 }
  0xc9   : > { %v260_v20 = vpop.permute.xlu0 %259 }
  0xcc   : > { %v318_v31 = vpop.permute.xlu1 %317 }
  0xcd   : > { %v234_v30 = vpop.permute.xlu0 %233  ;;  %v320_v36 = vsel %vm319_vm4, %v316_v19, %v318_v31  ;;  %v321_v37 = vsel %vm319_vm4, %v318_v31, %v316_v19  ;;  %vm367_vm4 = vcmp.eq.s32.totalorder %v362_v61, 1  ;;  %v397_v19 = vrot.slane %v389_v9, %v1101_v11  ;;  %v460_v61 = vld [vmem:[%s1285_s1] sm:$0xf] }
  0xce   : > { %v336_v38 = vsel %vm1116_vm6, %v321_v37, 0.0  ;;  %v337_v39 = vsel %vm1120_vm7, %v320_v36, 0.0  ;;  %vm444_vm6 = vcmp.gt.f32.partialorder %v443_v5, 0.5  ;;  %vm408_vm7 = vcmp.lt.s32.totalorder %v1104_v14, 112 }
  0xcf   : > { %v340_v42 = vrot.slane %v336_v38, 4  ;;  %v341_v43 = vrot.slane %v337_v39, 4  ;;  %v445_v26 = vsel %vm444_vm6, 1, %v896_v0  ;;  %vm1211_vm12 = vcmp.eq.s32.totalorder %v397_v19, 1 }
  0xd0   : > { %v236_v45 = vpop.permute.xlu1 %235  ;;  %v449_v38 = vrot.slane %v445_v26, %v1099_v10  ;;  %v453_v39 = vrot.slane %v445_v26, %v1101_v11 }
  0xd1   : > { %v262_v46 = vpop.permute.xlu0 %261  ;;  %344 = vst [vmem:[#allocation2 + $0x10] sm:$0xf0] %v340_v42  ;;  %345 = vst [vmem:[#allocation2 + $0x18] sm:$0xf0] %v341_v43  ;;  %v240_v51 = vsel %vm239_vm5, %v234_v30, %v236_v45  ;;  %v241_v52 = vsel %vm239_vm5, %v236_v45, %v234_v30  ;;  %vm368_vm5 = vcmp.eq.s32.totalorder %v366_v62, 1 }
  0xd2   : > { %v264_v53 = vsel %vm263_vm8, %v260_v20, %v262_v46  ;;  %v265_v54 = vsel %vm263_vm8, %v262_v46, %v260_v20  ;;  %v255_v55 = vsel %vm1126_vm9, %v241_v52, 0.0  ;;  %v256_v56 = vsel %vm1141_vm13, %v240_v51, 0.0 }
  0xd3   : > { %v280_v57 = vsel %vm1145_vm14, %v265_v54, 0.0  ;;  %v281_v58 = vsel %vm1149_vm15, %v264_v53, 0.0  ;;  %257 = vst [vmem:[#allocation2] sm:$0xf] %v255_v55  ;;  %258 = vst [vmem:[#allocation2 + $0x8] sm:$0xf] %v256_v56 }
  0xd4   : > { %v284_v59 = vrot.slane %v280_v57, 4  ;;  %v285_v60 = vrot.slane %v281_v58, 4  ;;  %v293_v63 = vpop.permute.xlu1 %292  ;;  %vm1197_vm8 = vcmp.eq.s32.totalorder %v418_v8, 1  ;;  %vm1201_vm9 = vcmp.eq.s32.totalorder %v422_v12, 1 }
  0xd5   : > { %v291_v2 = vpop.permute.xlu0 %290  ;;  %vm439_vm13 = vcmp.lt.s32.totalorder %v1104_v14, 111  ;;  %vm454_vm14 = vcmp.eq.s32.totalorder %v449_v38, 1  ;;  %vm455_vm15 = vcmp.eq.s32.totalorder %v453_v39, 1 }
  0xd6   : > { %288 = vst [vmem:[#allocation2] sm:$0xf0] %v284_v59  ;;  %289 = vst [vmem:[#allocation2 + $0x8] sm:$0xf0] %v285_v60  ;;  %v295_v3 = vsel %vm294_vm10, %v291_v2, %v293_v63  ;;  %v296_v4 = vsel %vm294_vm10, %v293_v63, %v291_v2  ;;  %vm383_vm10 = vcmp.lt.s32.totalorder %v1104_v14, 113 }
  0xd7   : > { %v311_v6 = vsel %vm1153_vm1, %v296_v4, 0.0  ;;  %v312_v7 = vsel %vm1157_vm2, %v295_v3, 0.0  ;;  %vm477_vm1 = vcmask 293888  }
  0xd8   : > { %313 = vst [vmem:[#allocation2 + $0x10] sm:$0xf] %v311_v6  ;;  %314 = vst [vmem:[#allocation2 + $0x18] sm:$0xf] %v312_v7  ;;  %v351_v13 = vpop.permute.xlu1 %350 }
  0xd9   : > { %v349_v15 = vpop.permute.xlu0 %348 }
  0xda   : > { %v353_v16 = vsel %vm352_vm3, %v349_v15, %v351_v13  ;;  %v354_v17 = vsel %vm352_vm3, %v351_v13, %v349_v15 }
  0xdb   : > { %v369_v20 = vsel %vm367_vm4, %v353_v16, 0.0  ;;  %v370_v21 = vsel %vm368_vm5, %v354_v17, 0.0 }
  0xdc   : > { %v373_v23 = vrot.slane %v369_v20, 4  ;;  %v374_v24 = vrot.slane %v370_v21, 4  ;;  %v407_v27 = vpop.permute.xlu1 %406 }
  0xdd   : > { %v405_v28 = vpop.permute.xlu0 %404  ;;  %v462_v33 = vld [vmem:[#allocation2 + $0x8] sm:$0xff]  ;;  %v461_v36 = vld [vmem:[#allocation2] sm:$0xff] }
  0xde   : > { %377 = vst [vmem:[#allocation2 + $0x20] sm:$0xf0] %v373_v23  ;;  %378 = vst [vmem:[#allocation2 + $0x28] sm:$0xf0] %v374_v24  ;;  %v409_v29 = vsel %vm408_vm7, %v405_v28, %v407_v27  ;;  %v410_v30 = vsel %vm408_vm7, %v407_v27, %v405_v28 }
  0xdf   : > { %v425_v0 = vsel %vm1197_vm8, %v409_v29, 0.0  ;;  %v426_v34 = vsel %vm1201_vm9, %v410_v30, 0.0  ;;  %v464_v35 = vld [vmem:[#allocation2 + $0x18] sm:$0xff]  ;;  %v463_v37 = vld [vmem:[#allocation2 + $0x10] sm:$0xff] }
  0xe0   : > { %v429_v40 = vrot.slane %v425_v0, 4  ;;  %v430_v41 = vrot.slane %v426_v34, 4  ;;  %v683_v42 = vpack.c.bf16 %v464_v35, %v462_v33  ;;  %v685_v43 = vpack.c.bf16 %v463_v37, %v461_v36  ;;  %v382_v44 = vpop.permute.xlu1 %381 }
  0xe1   : > { %v380_v45 = vpop.permute.xlu0 %379 }
  0xe2   : > { %433 = vst [vmem:[#allocation2 + $0x30] sm:$0xf0] %v429_v40  ;;  %434 = vst [vmem:[#allocation2 + $0x38] sm:$0xf0] %v430_v41  ;;  %v384_v46 = vsel %vm383_vm10, %v380_v45, %v382_v44  ;;  %v385_v47 = vsel %vm383_vm10, %v382_v44, %v380_v45  ;;  %684 = vmatprep.subr.bf16.mxu0 %v683_v42 }
  0xe3   : > { %v400_v10 = vsel %vm1207_vm11, %v384_v46, 0.0  ;;  %v401_v11 = vsel %vm1211_vm12, %v385_v47, 0.0  ;;  %686 = vmatpush1.bf16.msra.mxu0 %v685_v43 }
  0xe4   : > { %402 = vst [vmem:[#allocation2 + $0x30] sm:$0xf] %v400_v10  ;;  %403 = vst [vmem:[#allocation2 + $0x38] sm:$0xf] %v401_v11  ;;  %v438_v48 = vpop.permute.xlu1 %437 }
  0xe5   : > { %v436_v49 = vpop.permute.xlu0 %435  ;;  %v466_v54 = vld [vmem:[#allocation2 + $0x28] sm:$0xff]  ;;  %v465_v56 = vld [vmem:[#allocation2 + $0x20] sm:$0xff] }
  0xe6   : > { %v440_v50 = vsel %vm439_vm13, %v436_v49, %v438_v48  ;;  %v441_v51 = vsel %vm439_vm13, %v438_v48, %v436_v49 }
  0xe7   : > { %v456_v52 = vsel %vm454_vm14, %v440_v50, 0.0  ;;  %v457_v53 = vsel %vm455_vm15, %v441_v51, 0.0 }
  0xe8   : > { %458 = vst [vmem:[#allocation2 + $0x40] sm:$0xf] %v456_v52  ;;  %459 = vst [vmem:[#allocation2 + $0x48] sm:$0xf] %v457_v53 }
  0xeb   : > { %v468_v55 = vld [vmem:[#allocation2 + $0x38] sm:$0xff]  ;;  %v467_v57 = vld [vmem:[#allocation2 + $0x30] sm:$0xff] }
  0xec   : > { %v687_v58 = vpack.c.bf16 %v468_v55, %v466_v54  ;;  %v689_v59 = vpack.c.bf16 %v467_v57, %v465_v56 }
  0xee   : > { %688 = vmatprep.subr.bf16.mxu0 %v687_v58 }
  0xef   : > { %690 = vmatpush1.bf16.msra.mxu0 %v689_v59  ;;  %v470_v14 = vld [vmem:[#allocation2 + $0x48] sm:$0xf]  ;;  %v469_v60 = vld [vmem:[#allocation2 + $0x40] sm:$0xf] }
  0xf0   : > { %673 = vmatprep.subr.msk.mxu0 %vm481_vm0, %v470_v14 }
  0xf3   : > { %674 = vmatpush1.msk.msra.mxu0 %vm481_vm0, %v469_v60 }
  0xf4   : > { %675 = vmatmul.mubr.msk.f32.vlgmr.msra.gmra.mrb[0].mxu0 %vm477_vm1, %v460_v61 }
  0xf6   : > { %v475_v62 = vpop.permute.xlu0 %474 }
 0x1c7   : > { %v554_v63 = vpop.f32.mrb[0].mxu0 }
 0x1c8   : > { %v555_v2 = vadd.f32 %v554_v63, %v475_v62  ;;  %v556_v3 = vpop.f32.mrb[1].mxu0 }
 0x1c9   : > { %v557_v4 = vadd.f32 %v556_v3, %v475_v62 }
 0x1ca   : > { %v559_v5 = vmax.f32 %v555_v2, 0.0 }
 0x1cb   : > { %v560_v6 = vmax.f32 %v557_v4, 0.0 }
 0x1cd   : > { %v563_v7 = vcombine.low %v559_v5, %v560_v6 }
 0x1cf   : > { %v565_v8 = vadd.f32 %v563_v7, %v1083_v1 }
 0x1d1   : > { %566 = vst [vmem:[%s228_s12] sm:$0xff] %v565_v8 }
 0x1d2   : > { %833 = shalt.err (!%p830_p7)
}
 0x1d3   : > { %s834_s25 = scalar_lea.hbm %s1240_s21, 128  ;;  %s838_s6 = scalar_lea.hbm %s1288_s4, 256 }
 0x1d4   : > { %p835_p9 = scmp.ne.s32.totalorder %s1240_s21, %s834_s25  ;;  %p839_p0 = scmp.lt.u32.totalorder %s1240_s21, %s1288_s4 }
 0x1d5   : > { %p840_p11 = scmp.lt.u32.totalorder %s838_s6, %s834_s25  ;;  %p842_p4 = scmp.lt.u32.totalorder %s834_s25, %s1240_s21 }
 0x1d6   : > { %p836_p2 = pnand %p835_p9, %p1023_p12 }
 0x1d7   : > { %p841_p1 = por %p840_p11, %p839_p0 }
 0x1d8   : > { %p837_p5 = pneg %p836_p2 }
 0x1d9   : > { %p843_p6 = por %p842_p4, %p841_p1 }
 0x1db   : > { %p844_p8 = pnand %p843_p6, %p837_p5 }
 0x1dd   : > { %847 = shalt.err (!%p844_p8)
}
 0x1de   : > { %697 = dma.vmem_to_hbm [thread:$0]  (%p1023_p12), %s1242_s13, 128, %s1240_s21, %s568_s28  }
 0x1df PF: > { %s594_s26 = sand.u32 1, %s878_s15   ;;  %p1327_p10 = scmp.ne.s32.totalorder %s1293_s22, 0 }
 0x1e0   : > { %p1328_p13 = scmp.ge.s32.totalorder %s890_s18, 2  ;;  %s595_s8 = scalar_lea.sflag [#allocation5], %s594_s26 }
 0x1e2   : > { %p708_p3 = pnand %p1328_p13, %p1327_p10 }
 0x1e4   : > { %873 = dma.done.wait (!%p708_p3), %s595_s8, 128  }
 0x1e5   : > { %875 = vsyncadd (!%p708_p3), %s595_s8, 4294967168  ;;  %p18_p7 = scmp.ge.s32.totalorder %s988_s27, 4   ;;  %s1329_s15 = smov %s882_s16 }
 0x1e6   : > { %s1330_s16 = smov %s886_s17  ;;  %s1331_s17 = smov %s1019_s24 }
 0x1e7   : > { %s1332_s18 = smov %s988_s27  ;;  %20 = sbr.rel (!%p18_p7) target bundleno = 6 (0x6), region = 92 }
 0x1ee   :  { %600 = vsyncpa [#allocation4], 1 }
 0x1ef   :  { %602 = vsyncpa [#allocation4 + $0x1], 1 }
 0x1f0   :  { %603 = vsyncpa [#allocation7], 1 }
 0x1f1   :  { %604 = vsyncpa [#allocation5], 1 }
 0x1f2   :  { %606 = vsyncpa [#allocation5 + $0x1], 1 }

</bundles_post_ra>
